<compile_context>
chip_gen: v7x
topology: tpu7x:2x2x1
jax: 0.10.0
libtpu: 0.0.40
codegen_flags: <defaults>
</compile_context>

<pallas_src>
import functools

import jax
import jax.numpy as jnp
from jax.experimental import pallas as pl
from jax.experimental.pallas import tpu as pltpu


def gaussian_encoder_kernel(
    x_ref, w1_ref, wb1_ref, wb2_ref, b_ref, out_ref, *, hidden_dim, compute_dtype
):
    # Packed bias slab layout: [ b1 (hid) | b1mu,b1s (2*hid) | b2mu,b2s (2*out) ]
    b1 = b_ref[:, :hidden_dim]
    bb1 = b_ref[:, hidden_dim : 3 * hidden_dim]
    bb2 = b_ref[:, 3 * hidden_dim :]

    x = x_ref[...]
    w1 = w1_ref[...]
    wb1 = wb1_ref[...]
    wb2 = wb2_ref[...]
    if compute_dtype is not None:
        x = x.astype(compute_dtype)
        w1 = w1.astype(compute_dtype)
        wb1 = wb1.astype(compute_dtype)
        wb2 = wb2.astype(compute_dtype)

    # proj1 + ReLU (the torch code ReLUs the same pre-activation twice).
    hid = jnp.dot(x, w1, preferred_element_type=jnp.float32) + b1
    h = jnp.maximum(hid, 0.0)
    if compute_dtype is not None:
        h = h.astype(compute_dtype)

    # Fused level-1 branch matmul: [B, 2*hidden] = [ mu-branch | sigma-branch ]
    hb1 = jnp.dot(h, wb1, preferred_element_type=jnp.float32) + bb1
    if compute_dtype is not None:
        hb1 = hb1.astype(compute_dtype)

    # Fused level-2 branch matmul with block-diagonal weights:
    # out = [ outMu | outSigma ]  (lane-packed, single dense store)
    out = jnp.dot(hb1, wb2, preferred_element_type=jnp.float32) + bb2
    out_ref[...] = out.astype(out_ref.dtype)


def _pick_batch_tile(batch):
    """Largest power-of-two row tile (<=1024) that divides batch, else full batch."""
    if batch % 8 != 0:
        return batch
    for tb in (1024, 512, 256, 128, 64, 32, 16, 8):
        if batch % tb == 0:
            return tb
    return batch


def pack_params(p):
    """Pack the 5 linears into 3 weight slabs + 1 bias slab (done once)."""
    hidden_dim = p["w1"].shape[1]
    output_dim = p["w2mu"].shape[1]
    dtype = p["w2mu"].dtype

    wb1 = jnp.concatenate([p["w1mu"], p["w1s"]], axis=1)          # [hid, 2*hid]
    z = jnp.zeros((hidden_dim, output_dim), dtype)
    wb2 = jnp.concatenate(                                         # [2*hid, 2*out]
        [
            jnp.concatenate([p["w2mu"], z], axis=1),
            jnp.concatenate([z, p["w2s"]], axis=1),
        ],
        axis=0,
    )
    b = jnp.concatenate(                                           # [1, hid+2*hid+2*out]
        [p["b1"], p["b1mu"], p["b1s"], p["b2mu"], p["b2s"]], axis=1
    )
    return {"w1": p["w1"], "wb1": wb1, "wb2": wb2, "b": b}


def gaussian_encoder(x, packed, *, compute_dtype=None):
    """x: [B, input_dim] float32; packed: output of pack_params."""
    B, input_dim = x.shape
    hidden_dim = packed["w1"].shape[1]
    two_out = packed["wb2"].shape[1]
    output_dim = two_out // 2
    bias_width = packed["b"].shape[1]

    tb = _pick_batch_tile(B)
    grid = (B // tb,)

    kernel = functools.partial(
        gaussian_encoder_kernel, hidden_dim=hidden_dim, compute_dtype=compute_dtype
    )

    out = pl.pallas_call(
        kernel,
        out_shape=jax.ShapeDtypeStruct((B, two_out), jnp.float32),
        grid=grid,
        in_specs=[
            # batch-tiled activation
            pl.BlockSpec((tb, input_dim), lambda i: (i, 0)),
            # weights / biases stay VMEM-resident across the batch grid
            pl.BlockSpec((input_dim, hidden_dim), lambda i: (0, 0)),
            pl.BlockSpec((hidden_dim, 2 * hidden_dim), lambda i: (0, 0)),
            pl.BlockSpec((2 * hidden_dim, two_out), lambda i: (0, 0)),
            pl.BlockSpec((1, bias_width), lambda i: (0, 0)),
        ],
        out_specs=pl.BlockSpec((tb, two_out), lambda i: (i, 0)),
        compiler_params=pltpu.CompilerParams(dimension_semantics=("parallel",)),
    )(x, packed["w1"], packed["wb1"], packed["wb2"], packed["b"])

    return out[:, :output_dim], out[:, output_dim:]


def init_params(key, input_dim, hidden_dim, output_dim):
    """Deterministic init. Weights stored already transposed: [in, out]."""
    ks = jax.random.split(key, 10)

    def linear(kw, kb, in_d, out_d):
        # mimic nn.Linear's uniform(-1/sqrt(in), 1/sqrt(in)) init
        bound = 1.0 / jnp.sqrt(jnp.float32(in_d))
        w = jax.random.uniform(kw, (in_d, out_d), jnp.float32, -bound, bound)
        b = jax.random.uniform(kb, (1, out_d), jnp.float32, -bound, bound)
        return w, b

    p = {}
    p["w1"], p["b1"] = linear(ks[0], ks[1], input_dim, hidden_dim)
    p["w1mu"], p["b1mu"] = linear(ks[2], ks[3], hidden_dim, hidden_dim)
    p["w2mu"], p["b2mu"] = linear(ks[4], ks[5], hidden_dim, output_dim)
    p["w1s"], p["b1s"] = linear(ks[6], ks[7], hidden_dim, hidden_dim)
    p["w2s"], p["b2s"] = linear(ks[8], ks[9], hidden_dim, output_dim)
    return p


def reference(x, p):
    hid = x @ p["w1"] + p["b1"]
    h = jnp.maximum(hid, 0.0)
    mu = (h @ p["w1mu"] + p["b1mu"]) @ p["w2mu"] + p["b2mu"]
    sg = (h @ p["w1s"] + p["b1s"]) @ p["w2s"] + p["b2s"]
    return mu, sg


if __name__ == "__main__":
    key = jax.random.PRNGKey(0)
    k_x, k_p = jax.random.split(key)

    batch, input_dim, hidden_dim, output_dim = 8, 32, 32, 16
    x = jax.random.normal(k_x, (batch, input_dim), jnp.float32)
    params = init_params(k_p, input_dim, hidden_dim, output_dim)
    packed = pack_params(params)  # one-time packing (hoisted out of the kernel)

    out_mu, out_sigma = gaussian_encoder(x, packed)
    jax.block_until_ready((out_mu, out_sigma))

    ref_mu, ref_sigma = reference(x, params)
    assert out_mu.shape == (batch, output_dim)
    assert out_sigma.shape == (batch, output_dim)
    assert jnp.allclose(out_mu, ref_mu, atol=1e-5, rtol=1e-5)
    assert jnp.allclose(out_sigma, ref_sigma, atol=1e-5, rtol=1e-5)

    print("KERNEL_OK")
</pallas_src>

<mosaic_0001>
module attributes {stable_mosaic.version = 11 : i64} {
  func.func @gaussian_encoder_kernel(%arg0: i32, %arg1: memref<8x32xf32, #tpu.memory_space<vmem>>, %arg2: memref<32x32xf32, #tpu.memory_space<vmem>>, %arg3: memref<32x64xf32, #tpu.memory_space<vmem>>, %arg4: memref<64x32xf32, #tpu.memory_space<vmem>>, %arg5: memref<1x128xf32, #tpu.memory_space<vmem>>, %arg6: memref<8x32xf32, #tpu.memory_space<vmem>>) attributes {dimension_semantics = [#tpu.dimension_semantics<parallel>], iteration_bounds = array<i64: 1>, scalar_prefetch = 0 : i64, scratch_operands = 0 : i64, tpu.core_type = #tpu.core_type<tc>, window_params = [{transform_indices = @transform_0, window_bounds = array<i64: 8, 32>}, {pipeline_mode = #tpu.pipeline_mode<synchronous>, transform_indices = @transform_1, window_bounds = array<i64: 32, 32>}, {pipeline_mode = #tpu.pipeline_mode<synchronous>, transform_indices = @transform_2, window_bounds = array<i64: 32, 64>}, {pipeline_mode = #tpu.pipeline_mode<synchronous>, transform_indices = @transform_3, window_bounds = array<i64: 64, 32>}, {pipeline_mode = #tpu.pipeline_mode<synchronous>, transform_indices = @transform_4, window_bounds = array<i64: 1, 128>}, {transform_indices = @transform_5, window_bounds = array<i64: 8, 32>}]} {
    %c0 = arith.constant 0 : index
    %c0_0 = arith.constant 0 : index
    %0 = vector.load %arg5[%c0, %c0_0] : memref<1x128xf32, #tpu.memory_space<vmem>>, vector<1x32xf32>
    %c0_1 = arith.constant 0 : index
    %c32 = arith.constant 32 : index
    %1 = vector.load %arg5[%c0_1, %c32] : memref<1x128xf32, #tpu.memory_space<vmem>>, vector<1x64xf32>
    %c0_2 = arith.constant 0 : index
    %c96 = arith.constant 96 : index
    %2 = vector.load %arg5[%c0_2, %c96] : memref<1x128xf32, #tpu.memory_space<vmem>>, vector<1x32xf32>
    %c0_3 = arith.constant 0 : index
    %c0_4 = arith.constant 0 : index
    %3 = vector.load %arg1[%c0_3, %c0_4] : memref<8x32xf32, #tpu.memory_space<vmem>>, vector<8x32xf32>
    %c0_5 = arith.constant 0 : index
    %c0_6 = arith.constant 0 : index
    %4 = vector.load %arg2[%c0_5, %c0_6] : memref<32x32xf32, #tpu.memory_space<vmem>>, vector<32x32xf32>
    %c0_7 = arith.constant 0 : index
    %c0_8 = arith.constant 0 : index
    %5 = vector.load %arg3[%c0_7, %c0_8] : memref<32x64xf32, #tpu.memory_space<vmem>>, vector<32x64xf32>
    %c0_9 = arith.constant 0 : index
    %c0_10 = arith.constant 0 : index
    %6 = vector.load %arg4[%c0_9, %c0_10] : memref<64x32xf32, #tpu.memory_space<vmem>>, vector<64x32xf32>
    %cst = arith.constant dense<0.000000e+00> : vector<8x32xf32>
    %7 = tpu.matmul %3, %4, %cst {dimension_numbers = #tpu.dot_dimension_numbers<[1], [0], [0], [1], [0, 0, 1, 1], [], []>} : vector<8x32xf32>, vector<32x32xf32>, vector<8x32xf32> -> vector<8x32xf32>
    %8 = vector.broadcast %0 : vector<1x32xf32> to vector<8x32xf32>
    %9 = arith.addf %7, %8 : vector<8x32xf32>
    %cst_11 = arith.constant 0.000000e+00 : f32
    %10 = vector.broadcast %cst_11 : f32 to vector<8x32xf32>
    %11 = arith.maximumf %9, %10 : vector<8x32xf32>
    %cst_12 = arith.constant dense<0.000000e+00> : vector<8x64xf32>
    %12 = tpu.matmul %11, %5, %cst_12 {dimension_numbers = #tpu.dot_dimension_numbers<[1], [0], [0], [1], [0, 0, 1, 1], [], []>} : vector<8x32xf32>, vector<32x64xf32>, vector<8x64xf32> -> vector<8x64xf32>
    %13 = vector.broadcast %1 : vector<1x64xf32> to vector<8x64xf32>
    %14 = arith.addf %12, %13 : vector<8x64xf32>
    %cst_13 = arith.constant dense<0.000000e+00> : vector<8x32xf32>
    %15 = tpu.matmul %14, %6, %cst_13 {dimension_numbers = #tpu.dot_dimension_numbers<[1], [0], [0], [1], [0, 0, 1, 1], [], []>} : vector<8x64xf32>, vector<64x32xf32>, vector<8x32xf32> -> vector<8x32xf32>
    %16 = vector.broadcast %2 : vector<1x32xf32> to vector<8x32xf32>
    %17 = arith.addf %15, %16 : vector<8x32xf32>
    %c0_14 = arith.constant 0 : index
    %c0_15 = arith.constant 0 : index
    %18 = vector.load %arg6[%c0_14, %c0_15] : memref<8x32xf32, #tpu.memory_space<vmem>>, vector<8x32xf32>
    tpu.vector_store %arg6[%c0_14, %c0_15], %17 {strides = array<i32>} : memref<8x32xf32, #tpu.memory_space<vmem>>, vector<8x32xf32>,
    return
  }
  func.func @transform_0(%arg0: i32) -> (i32, i32) {
    %c0_i32 = arith.constant 0 : i32
    %c0_i32_0 = arith.constant 0 : i32
    return %arg0, %c0_i32 : i32, i32
  }
  func.func @transform_1(%arg0: i32) -> (i32, i32) {
    %c0_i32 = arith.constant 0 : i32
    %c0_i32_0 = arith.constant 0 : i32
    %c0_i32_1 = arith.constant 0 : i32
    return %c0_i32, %c0_i32_0 : i32, i32
  }
  func.func @transform_2(%arg0: i32) -> (i32, i32) {
    %c0_i32 = arith.constant 0 : i32
    %c0_i32_0 = arith.constant 0 : i32
    %c0_i32_1 = arith.constant 0 : i32
    return %c0_i32, %c0_i32_0 : i32, i32
  }
  func.func @transform_3(%arg0: i32) -> (i32, i32) {
    %c0_i32 = arith.constant 0 : i32
    %c0_i32_0 = arith.constant 0 : i32
    %c0_i32_1 = arith.constant 0 : i32
    return %c0_i32, %c0_i32_0 : i32, i32
  }
  func.func @transform_4(%arg0: i32) -> (i32, i32) {
    %c0_i32 = arith.constant 0 : i32
    %c0_i32_0 = arith.constant 0 : i32
    %c0_i32_1 = arith.constant 0 : i32
    return %c0_i32, %c0_i32_0 : i32, i32
  }
  func.func @transform_5(%arg0: i32) -> (i32, i32) {
    %c0_i32 = arith.constant 0 : i32
    %c0_i32_0 = arith.constant 0 : i32
    return %arg0, %c0_i32 : i32, i32
  }
}

</mosaic_0001>

<bundles_post_ra>
// kernel: tpu_custom_call.1
= control target key start
LH: loop header
LB: loop body
LE: loop exit
PB: predicated region body
PF: predicated region fallthrough
CT: control target
= control target key end

     0   :  { %v406_v3 = vmov 0.0|0.0   ;;  %vm407_vm0 = vmmov 0   ;;  %v408_v6 = vmov 0.0   ;;  %s514_s0 = inlined_call_operand.vmem [shape: f32[8,32], index: 0, kind: input, shape index: {}]   ;;  %s515_s1 = inlined_call_operand.vmem [shape: f32[32,32], index: 1, kind: input, shape index: {}]   ;;  %s516_s2 = inlined_call_operand.vmem [shape: f32[32,64], index: 2, kind: input, shape index: {}]   ;;  %s517_s3 = inlined_call_operand.vmem [shape: f32[64,32], index: 3, kind: input, shape index: {}]   ;;  %s518_s4 = inlined_call_operand.vmem [shape: f32[1,128], index: 4, kind: input, shape index: {}]   ;;  %s519_s5 = inlined_call_operand.hbm [shape: f32[8,32], index: 5, kind: output, shape index: {}]  }
   0x1   :  { %v23_v0 = vld [vmem:[%s515_s1] sm:$0xff]  ;;  %v24_v1 = vld [vmem:[%s515_s1 + $0x8] sm:$0xff]  ;;  %v25_v2 = vld [vmem:[%s515_s1 + $0x10] sm:$0xff]  ;;  %352 = vmatprep.subr.bf16.mxu1 %v406_v3  ;;  %319 = vmatprep.mubr.msk.f32.mxu1 %vm407_vm0, %v408_v6 }
   0x2   :  { %v353_v4 = vpack.c.bf16 %v24_v1, %v23_v0  ;;  %v26_v5 = vld [vmem:[%s515_s1 + $0x18] sm:$0xff]  ;;  %364 = vmatprep.subr.bf16.mxu0 %v406_v3  ;;  %349 = vmatprep.mubr.msk.f32.mxu0 %vm407_vm0, %v408_v6 }
   0x3   :  { %10 = vsyncpa [#allocation3], 0  ;;  %v356_v7 = vpack.c.bf16 %v26_v5, %v25_v2  ;;  %v27_v8 = vld [vmem:[%s516_s2] sm:$0xff]  ;;  %v28_v9 = vld [vmem:[%s516_s2 + $0x8] sm:$0xff]  ;;  %vm45_vm1 = vcmask 261120   ;;  %s409_s17 = smov 96  }
   0x4   :  { %354 = vmatpush3.bf16.msra.mxu1 %v353_v4  ;;  %v22_v10 = vld [vmem:[%s514_s0] sm:$0xff]  ;;  %v359_v11 = vpack.c.bf16 %v28_v9, %v27_v8  ;;  %v29_v12 = vld [vmem:[%s516_s2 + $0x10] sm:$0xff]  ;;  %v30_v13 = vld [vmem:[%s516_s2 + $0x18] sm:$0xff]  ;;  %s410_s26 = smov 32   ;;  %vm199_vm2 = vcmask 523264  }
   0x5   :  { %355 = vmatprep.subr.bf16.mxu1 %v406_v3  ;;  %v362_v14 = vpack.c.bf16 %v30_v13, %v29_v12  ;;  %v288_v15 = vld [vmem:[%s518_s4] ss:$0 sm:$0xff]  ;;  %v32_v17 = vld [vmem:[%s517_s3 + $0x8] sm:$0xff]  ;;  %v33_v18 = vld [vmem:[%s517_s3 + $0x10] sm:$0xff] }
   0x6   :  { %v31_v16 = vld [vmem:[%s517_s3] sm:$0xff]  ;;  %120 = vrot.lane.b32.xlu0 %v288_v15, %s409_s17  ;;  %v34_v20 = vld [vmem:[%s517_s3 + $0x18] sm:$0xff]  ;;  %v36_v23 = vld [vmem:[%s517_s3 + $0x28] sm:$0xff] }
   0x7   :  { %v365_v19 = vpack.c.bf16 %v32_v17, %v31_v16  ;;  %v368_v21 = vpack.c.bf16 %v34_v20, %v33_v18  ;;  %v35_v22 = vld [vmem:[%s517_s3 + $0x20] sm:$0xff]  ;;  %v37_v25 = vld [vmem:[%s517_s3 + $0x30] sm:$0xff]  ;;  %v38_v26 = vld [vmem:[%s517_s3 + $0x38] sm:$0xff]  ;;  %s411_s3 = smov [#allocation2]  }
   0x8   :  { %357 = vmatpush3.bf16.msra.mxu1 %v356_v7  ;;  %v371_v24 = vpack.c.bf16 %v36_v23, %v35_v22  ;;  %v374_v27 = vpack.c.bf16 %v38_v26, %v37_v25  ;;  %s280_s27 = sshll.u32 %s411_s3, 4  ;;  %s281_s27 = int_to_ptr.vmem [resolvable:$true] %s280_s27 }
   0x9   :  { %358 = vmatprep.subr.bf16.mxu1 %v406_v3  ;;  %366 = vmatpush3.bf16.msra.mxu0 %v365_v19  ;;  %s382_s28 = scalar_lea.vmem %s281_s27, 128  ;;  %p387_p1 = scmp.lt.s32.totalorder %s281_s27, %s281_s27 }
   0xa   :  { %367 = vmatprep.subr.bf16.mxu0 %v406_v3  ;;  %196 = vrot.lane.b32.xlu0 %v288_v15, %s410_s26  ;;  %p383_p0 = scmp.ne.s32.totalorder %s281_s27, %s382_s28  ;;  %p388_p2 = scmp.lt.s32.totalorder %s382_s28, %s382_s28 }
   0xb   :  { %320 = vmatmul.mubr.msk.f32.vlgmr.msra.gmra.mrb[0].mxu1 %vm45_vm1, %v22_v10 }
   0xc   :  { %360 = vmatpush3.bf16.msra.mxu1 %v359_v11  ;;  %330 = vmatprep.mubr.msk.f32.mxu1 %vm407_vm0, %v408_v6  ;;  %p389_p3 = por %p388_p2, %p387_p1 }
   0xd   :  { %361 = vmatprep.subr.bf16.mxu1 %v406_v3  ;;  %369 = vmatpush3.bf16.msra.mxu0 %v368_v21 }
   0xe   :  { %370 = vmatprep.subr.bf16.mxu0 %v406_v3  ;;  %p390_p4 = pnand %p389_p3, %p383_p0 }
  0x10   :  { %363 = vmatpush3.bf16.msra.mxu1 %v362_v14 }
  0x11   :  { %372 = vmatpush3.bf16.msra.mxu0 %v371_v24 }
  0x12   :  { %373 = vmatprep.subr.bf16.mxu0 %v406_v3 }
  0x15   :  { %375 = vmatpush3.bf16.msra.mxu0 %v374_v27 }
  0x78   :  { %v121_v32 = vpop.permute.xlu0 %120 }
  0x7c   :  { %v197_v36 = vpop.permute.xlu0 %196 }
  0xde   :  { %v115_v28 = vpop.f32.mrb[0].mxu1 }
  0xdf   :  { %v116_v29 = vadd.f32 %v288_v15, %v115_v28  ;;  %v321_v30 = vpop.f32.mrb[1].mxu1 }
  0xe1   :  { %v119_v31 = vmax.f32 %v116_v29, 0.0 }
  0xe3   :  { %331 = vmatmul.mubr.msk.f32.vlgmr.msra.gmra.mrb[2].mxu1 %vm45_vm1, %v119_v31 }
 0x1b6   :  { %v192_v33 = vpop.f32.mrb[2].mxu1 }
 0x1b7   :  { %v193_v34 = vadd.f32 %v192_v33, %v121_v32  ;;  %v332_v35 = vpop.f32.mrb[3].mxu1 }
 0x1b9   :  { %350 = vmatmul.mubr.msk.f32.vlgmr.msra.gmra.mrb[0].mxu0 %vm199_vm2, %v193_v34 }
 0x28c   :  { %v269_v37 = vpop.f32.mrb[0].mxu0 }
 0x28d   :  { %v270_v38 = vadd.f32 %v269_v37, %v197_v36  ;;  %v351_v39 = vpop.f32.mrb[1].mxu0 }
 0x28f   :  { %273 = vst.msk [vmem:[#allocation2] sm:$0xff] %vm45_vm1, %v270_v38 }
 0x290   :  { %393 = shalt.err (!%p390_p4)
}
 0x291   :  { %s394_s30 = scalar_lea.hbm %s519_s5, 128 }
 0x292   :  { %p395_p5 = scmp.ne.s32.totalorder %s519_s5, %s394_s30  ;;  %p398_p6 = scmp.lt.u32.totalorder %s394_s30, %s519_s5 }
 0x294   :  { %p400_p7 = pnand %p398_p6, %p395_p5 }
 0x296   :  { %403 = shalt.err (!%p400_p7)
}
 0x297   :  { %283 = dma.vmem_to_hbm [thread:$0]  %s281_s27, 128, %s519_s5, [#allocation3]  }
 0x298   :  { %404 = dma.done.wait [#allocation3], 128  }
 0x299   :  { %405 = vsyncadd [#allocation3], 4294967168 }
 0x29a   :  { %287 = vsyncpa [#allocation3], 1 }

</bundles_post_ra>
